<compile_context>
chip_gen: v5e
topology: v5e:2x2
jax: 0.10.0
libtpu: 0.0.40
codegen_flags: <defaults>
</compile_context>

<pallas_src>
import numpy as np
import jax
import jax.numpy as jnp
from jax.experimental import pallas as pl
from jax.experimental.pallas import tpu as pltpu

_F32 = 4
_K_DENSE_MAX_BYTES = 4 * 1024 * 1024  # combined-K path only when dense K is at most this


def bilinear_matrix(n_in: int, n_out: int) -> np.ndarray:
    """Row-stochastic (n_out, n_in) matrix A such that y = A @ x matches
    PyTorch nn.Upsample(mode='bilinear', align_corners=True) along one axis.
    (Degenerate n_in==1 / n_out==1 handling is only exercised for trivial sizes.)"""
    A = np.zeros((n_out, n_in), dtype=np.float32)
    if n_out == 1 or n_in == 1:
        A[:, 0] = 1.0
        return A
    idx = np.arange(n_out)
    src = idx * (n_in - 1) / (n_out - 1)
    i0 = np.clip(np.floor(src).astype(np.int64), 0, n_in - 1)
    i1 = np.minimum(i0 + 1, n_in - 1)
    frac = (src - i0).astype(np.float32)
    A[idx, i0] += 1.0 - frac
    A[idx, i1] += frac
    return A


def _divisors(n: int):
    return [d for d in range(1, n + 1) if n % d == 0]


def _vmem_capacity_bytes() -> int:
    """Generation-aware VMEM capacity; conservative (v7x-sized) fallback."""
    try:
        cap = int(pltpu.get_tpu_info().vmem_capacity_bytes)
        if cap > 0:
            return cap
    except Exception:
        pass
    return 64 * 1024 * 1024


# ----------------------------- combined-K path ------------------------------

def _combined_resident_bytes(cin, cout, hw, band_cols):
    k_blk = hw * band_cols * _F32
    x_blk = cin * hw * _F32
    out_blk = cout * band_cols * _F32
    y_tmp = cout * hw * _F32
    up_tmp = cout * band_cols * _F32
    small = (cout * cin + cout) * _F32
    # double-buffered pipelined blocks + in-kernel temporaries
    return 2 * (k_blk + x_blk + out_blk) + y_tmp + up_tmp + 2 * small


def _choose_band_combined(batch, cin, cout, hout, wout, hw, block_budget):
    valid = [t for t in _divisors(hout) if (t * wout) % 128 == 0 or t == hout]
    fits = [t for t in valid
            if _combined_resident_bytes(cin, cout, hw, t * wout) <= block_budget]
    if not fits:
        fits = [min(valid)]  # dense K is already capped at _K_DENSE_MAX_BYTES
    if batch == 1:
        split = [t for t in fits if hout // t >= 2]
        if split:
            return max(split)  # keep both v7x TensorCores busy
    return max(fits)


def _combined_kernel(x_ref, w_ref, b_ref, k_ref, o_ref):
    # x_ref: (1, Cin, H*W)      w_ref: (Cout, Cin)   b_ref: (Cout, 1)
    # k_ref: (H*W, TH*Wout)     o_ref: (1, Cout, TH*Wout)
    y = jnp.dot(w_ref[...], x_ref[0], preferred_element_type=jnp.float32)   # (Cout, HW)
    up = jnp.dot(y, k_ref[...], preferred_element_type=jnp.float32)         # (Cout, band)
    o_ref[0] = up + b_ref[...]                                              # bias last


# ------------------------------ separable path ------------------------------

def _separable_resident_bytes(cin, cout, h, w, wout, th):
    x_blk = cin * h * w * _F32
    m_blk = cout * th * cin * h * _F32
    out_blk = cout * th * wout * _F32
    awt = w * wout * _F32
    bias = cout * th * _F32
    z_tmp = cin * h * wout * _F32
    y_tmp = cout * th * wout * _F32
    return 2 * (x_blk + m_blk + out_blk) + awt + bias + z_tmp + y_tmp


def _choose_band_separable(batch, cin, cout, h, w, hout, wout, block_budget):
    valid = [t for t in _divisors(hout) if t % 8 == 0 or t == hout]
    fits = [t for t in valid
            if _separable_resident_bytes(cin, cout, h, w, wout, t) <= block_budget]
    if not fits:
        # For extreme H*W the Cin*H contraction dim would also need tiling.
        fits = [min(valid)]
    if batch == 1:
        split = [t for t in fits if hout // t >= 2]
        if split:
            return max(split)  # keep both v7x TensorCores busy
    return max(fits)


def _separable_kernel(x_ref, awt_ref, m_ref, b_ref, o_ref):
    # x_ref: (1, Cin*H, W)   awt_ref: (W, Wout)   m_ref: (1, Cout*TH, Cin*H)
    # b_ref: (Cout*TH, 1)    o_ref: (1, Cout, TH, Wout)
    z = jnp.dot(x_ref[0], awt_ref[...], preferred_element_type=jnp.float32)  # (Cin*H, Wout)
    y = jnp.dot(m_ref[0], z, preferred_element_type=jnp.float32)             # (Cout*TH, Wout)
    y = y + b_ref[...]
    _, co, th, wo = o_ref.shape
    o_ref[0] = y.reshape(co, th, wo)


# --------------------------------- wrapper -----------------------------------

def upsample_conv(x, conv_w, conv_b, scale_factor: int = 2):
    """x: (B, Cin, H, W) f32; conv_w: (Cout, Cin) (1x1 kernel); conv_b: (Cout,)."""
    B, Cin, H, W = x.shape
    Cout = conv_w.shape[0]
    Hout, Wout = H * scale_factor, W * scale_factor
    HW = H * W

    vmem_cap = _vmem_capacity_bytes()
    vmem_limit = int(vmem_cap * 0.75)        # ~96 MiB on v5e/v6e, ~48 MiB on v7x
    block_budget = int(vmem_limit * 0.6)     # headroom for Mosaic internal scratch

    ah = bilinear_matrix(H, Hout)            # (Hout, H)
    aw = bilinear_matrix(W, Wout)            # (Wout, W)

    sem = ("parallel", "parallel")
    k_dense_bytes = HW * Hout * Wout * _F32
    use_combined = ((Hout * Wout) % 128 == 0) and (k_dense_bytes <= _K_DENSE_MAX_BYTES)

    if use_combined:
        th = _choose_band_combined(B, Cin, Cout, Hout, Wout, HW, block_budget)
        n_bands = Hout // th
        band_cols = th * Wout                             # multiple of 128 (or full)

        k = jnp.asarray(np.kron(ah, aw).T, dtype=jnp.float32)   # (HW, Hout*Wout)
        x2 = x.reshape(B, Cin, HW).astype(jnp.float32)
        w2 = conv_w.astype(jnp.float32)
        b2 = conv_b.reshape(Cout, 1).astype(jnp.float32)

        cost = pl.CostEstimate(
            flops=2 * B * Cout * HW * (Cin + Hout * Wout),
            transcendentals=0,
            bytes_accessed=_F32 * (n_bands * B * Cin * HW + HW * Hout * Wout
                                   + B * Cout * Hout * Wout + Cout * Cin + Cout),
        )

        out2 = pl.pallas_call(
            _combined_kernel,
            out_shape=jax.ShapeDtypeStruct((B, Cout, Hout * Wout), jnp.float32),
            grid_spec=pltpu.PrefetchScalarGridSpec(
                num_scalar_prefetch=0,
                grid=(n_bands, B),            # band OUTER, batch INNER: K block
                in_specs=[                    # index (0, j) constant over b -> one DMA
                    pl.BlockSpec((1, Cin, HW), lambda j, b: (b, 0, 0)),
                    pl.BlockSpec((Cout, Cin), lambda j, b: (0, 0)),
                    pl.BlockSpec((Cout, 1), lambda j, b: (0, 0)),
                    pl.BlockSpec((HW, band_cols), lambda j, b: (0, j)),
                ],
                out_specs=pl.BlockSpec((1, Cout, band_cols), lambda j, b: (b, 0, j)),
            ),
            compiler_params=pltpu.CompilerParams(
                dimension_semantics=sem,
                vmem_limit_bytes=vmem_limit,
            ),
            cost_estimate=cost,
        )(x2, w2, b2, k)
        return out2.reshape(B, Cout, Hout, Wout)

    # ---- separable two-matmul path (non-tiny / non-128-aligned H*W) ----
    th = _choose_band_separable(B, Cin, Cout, H, W, Hout, Wout, block_budget)
    n_bands = Hout // th

    ah_b = jnp.asarray(ah.reshape(n_bands, th, H), dtype=jnp.float32)   # (J, TH, H)
    awt = jnp.asarray(aw.T, dtype=jnp.float32)                          # (W, Wout)
    # Mb[j, co*TH + t, ci*H + h] = conv_w[co, ci] * ah[j*TH + t, h]
    m = jnp.einsum('oc,jth->jotch', conv_w.astype(jnp.float32), ah_b)
    m = m.reshape(n_bands, Cout * th, Cin * H)
    bias_big = jnp.repeat(conv_b.astype(jnp.float32), th).reshape(Cout * th, 1)
    x3 = x.reshape(B, Cin * H, W).astype(jnp.float32)

    cost = pl.CostEstimate(
        flops=2 * B * (Cin * H * W * Wout + Cout * Hout * Cin * H * Wout),
        transcendentals=0,
        bytes_accessed=_F32 * (n_bands * B * Cin * H * W + Cout * Hout * Cin * H
                               + B * Cout * Hout * Wout + W * Wout + Cout * Hout),
    )

    out = pl.pallas_call(
        _separable_kernel,
        out_shape=jax.ShapeDtypeStruct((B, Cout, Hout, Wout), jnp.float32),
        grid_spec=pltpu.PrefetchScalarGridSpec(
            num_scalar_prefetch=0,
            grid=(n_bands, B),                # band OUTER, batch INNER: awT and the
            in_specs=[                        # per-band M block stay resident over b
                pl.BlockSpec((1, Cin * H, W), lambda j, b: (b, 0, 0)),
                pl.BlockSpec((W, Wout), lambda j, b: (0, 0)),
                pl.BlockSpec((1, Cout * th, Cin * H), lambda j, b: (j, 0, 0)),
                pl.BlockSpec((Cout * th, 1), lambda j, b: (0, 0)),
            ],
            out_specs=pl.BlockSpec((1, Cout, th, Wout), lambda j, b: (b, 0, j, 0)),
        ),
        compiler_params=pltpu.CompilerParams(
            dimension_semantics=sem,
            vmem_limit_bytes=vmem_limit,
        ),
        cost_estimate=cost,
    )(x3, awt, m, bias_big)
    return out


def reference(x, conv_w, conv_b, scale_factor: int = 2):
    B, Cin, H, W = x.shape
    Hout, Wout = H * scale_factor, W * scale_factor
    ah = jnp.asarray(bilinear_matrix(H, Hout))
    aw = jnp.asarray(bilinear_matrix(W, Wout))
    up = jnp.einsum("oh,bchw,pw->bcop", ah, x, aw)
    out = jnp.einsum("kc,bcop->bkop", conv_w, up) + conv_b[None, :, None, None]
    return out


if __name__ == "__main__":
    key = jax.random.PRNGKey(0)
    k_x, k_w, k_b, k_x2 = jax.random.split(key, 4)

    # Primary shape (combined-K path): B=2, Cin=4, Cout=8, H=W=16.
    B, Cin, Cout, H, W = 2, 4, 8, 16, 16
    x = jax.random.normal(k_x, (B, Cin, H, W), dtype=jnp.float32)
    conv_w = jax.random.normal(k_w, (Cout, Cin), dtype=jnp.float32) * 0.1  # 1x1 kernel
    conv_b = jax.random.normal(k_b, (Cout,), dtype=jnp.float32) * 0.1

    out = jax.block_until_ready(upsample_conv(x, conv_w, conv_b, scale_factor=2))
    ref = reference(x, conv_w, conv_b, scale_factor=2)
    assert out.shape == (B, Cout, 2 * H, 2 * W), out.shape
    np.testing.assert_allclose(np.asarray(out), np.asarray(ref), atol=1e-4, rtol=1e-4)

    # Secondary shape exercises the separable path (Hout*Wout not a multiple of
    # 128) and the B==1 forced band split: B=1, H=W=20.
    x_b = jax.random.normal(k_x2, (1, Cin, 20, 20), dtype=jnp.float32)
    out_b = jax.block_until_ready(upsample_conv(x_b, conv_w, conv_b, scale_factor=2))
    ref_b = reference(x_b, conv_w, conv_b, scale_factor=2)
    assert out_b.shape == (1, Cout, 40, 40), out_b.shape
    np.testing.assert_allclose(np.asarray(out_b), np.asarray(ref_b), atol=1e-4, rtol=1e-4)

    print("KERNEL_OK")
</pallas_src>

<mosaic_0001>
module attributes {stable_mosaic.version = 11 : i64} {
  func.func @_combined_kernel(%arg0: i32, %arg1: i32, %arg2: memref<1x4x256xf32, #tpu.memory_space<vmem>>, %arg3: memref<8x4xf32, #tpu.memory_space<vmem>>, %arg4: memref<8x1xf32, #tpu.memory_space<vmem>>, %arg5: memref<256x1024xf32, #tpu.memory_space<vmem>>, %arg6: memref<1x8x1024xf32, #tpu.memory_space<vmem>>) attributes {dimension_semantics = [#tpu.dimension_semantics<parallel>, #tpu.dimension_semantics<parallel>], iteration_bounds = array<i64: 1, 2>, scalar_prefetch = 0 : i64, scratch_operands = 0 : i64, tpu.core_type = #tpu.core_type<tc>, window_params = [{transform_indices = @transform_0, window_bounds = array<i64: 1, 4, 256>}, {pipeline_mode = #tpu.pipeline_mode<synchronous>, transform_indices = @transform_1, window_bounds = array<i64: 8, 4>}, {pipeline_mode = #tpu.pipeline_mode<synchronous>, transform_indices = @transform_2, window_bounds = array<i64: 8, 1>}, {transform_indices = @transform_3, window_bounds = array<i64: 256, 1024>}, {transform_indices = @transform_4, window_bounds = array<i64: 1, 8, 1024>}]} {
    %c0 = arith.constant 0 : index
    %c0_0 = arith.constant 0 : index
    %0 = vector.load %arg3[%c0, %c0_0] : memref<8x4xf32, #tpu.memory_space<vmem>>, vector<8x4xf32>
    %c0_1 = arith.constant 0 : index
    %c0_2 = arith.constant 0 : index
    %c0_3 = arith.constant 0 : index
    %1 = vector.load %arg2[%c0_1, %c0_2, %c0_3] : memref<1x4x256xf32, #tpu.memory_space<vmem>>, vector<1x4x256xf32>
    %2 = vector.shape_cast %1 : vector<1x4x256xf32> to vector<4x256xf32>
    %cst = arith.constant dense<0.000000e+00> : vector<8x256xf32>
    %3 = tpu.matmul %0, %2, %cst {dimension_numbers = #tpu.dot_dimension_numbers<[1], [0], [0], [1], [0, 0, 1, 1], [], []>} : vector<8x4xf32>, vector<4x256xf32>, vector<8x256xf32> -> vector<8x256xf32>
    %c0_4 = arith.constant 0 : index
    %c0_5 = arith.constant 0 : index
    %4 = vector.load %arg5[%c0_4, %c0_5] : memref<256x1024xf32, #tpu.memory_space<vmem>>, vector<256x1024xf32>
    %cst_6 = arith.constant dense<0.000000e+00> : vector<8x1024xf32>
    %5 = tpu.matmul %3, %4, %cst_6 {dimension_numbers = #tpu.dot_dimension_numbers<[1], [0], [0], [1], [0, 0, 1, 1], [], []>} : vector<8x256xf32>, vector<256x1024xf32>, vector<8x1024xf32> -> vector<8x1024xf32>
    %c0_7 = arith.constant 0 : index
    %c0_8 = arith.constant 0 : index
    %6 = vector.load %arg4[%c0_7, %c0_8] : memref<8x1xf32, #tpu.memory_space<vmem>>, vector<8x1xf32>
    %7 = vector.broadcast %6 : vector<8x1xf32> to vector<8x1024xf32>
    %8 = arith.addf %5, %7 : vector<8x1024xf32>
    %c0_9 = arith.constant 0 : index
    %c0_10 = arith.constant 0 : index
    %c0_11 = arith.constant 0 : index
    %9 = vector.load %arg6[%c0_9, %c0_10, %c0_11] : memref<1x8x1024xf32, #tpu.memory_space<vmem>>, vector<1x8x1024xf32>
    %10 = vector.shape_cast %9 : vector<1x8x1024xf32> to vector<8x1024xf32>
    %11 = vector.shape_cast %8 : vector<8x1024xf32> to vector<1x8x1024xf32>
    tpu.vector_store %arg6[%c0_9, %c0_10, %c0_11], %11 {strides = array<i32>} : memref<1x8x1024xf32, #tpu.memory_space<vmem>>, vector<1x8x1024xf32>,
    return
  }
  func.func @transform_0(%arg0: i32, %arg1: i32) -> (i32, i32, i32) {
    %c0_i32 = arith.constant 0 : i32
    %c0_i32_0 = arith.constant 0 : i32
    %c0_i32_1 = arith.constant 0 : i32
    return %arg1, %c0_i32, %c0_i32_0 : i32, i32, i32
  }
  func.func @transform_1(%arg0: i32, %arg1: i32) -> (i32, i32) {
    %c0_i32 = arith.constant 0 : i32
    %c0_i32_0 = arith.constant 0 : i32
    %c0_i32_1 = arith.constant 0 : i32
    return %c0_i32, %c0_i32_0 : i32, i32
  }
  func.func @transform_2(%arg0: i32, %arg1: i32) -> (i32, i32) {
    %c0_i32 = arith.constant 0 : i32
    %c0_i32_0 = arith.constant 0 : i32
    %c0_i32_1 = arith.constant 0 : i32
    return %c0_i32, %c0_i32_0 : i32, i32
  }
  func.func @transform_3(%arg0: i32, %arg1: i32) -> (i32, i32) {
    %c0_i32 = arith.constant 0 : i32
    %c0_i32_0 = arith.constant 0 : i32
    return %c0_i32, %arg0 : i32, i32
  }
  func.func @transform_4(%arg0: i32, %arg1: i32) -> (i32, i32, i32) {
    %c0_i32 = arith.constant 0 : i32
    %c0_i32_0 = arith.constant 0 : i32
    return %arg1, %c0_i32, %arg0 : i32, i32, i32
  }
}

</mosaic_0001>

<bundles_post_ra>
// kernel: tpu_custom_call.1
= control target key start
LH: loop header
LB: loop body
LE: loop exit
PB: predicated region body
PF: predicated region fallthrough
CT: control target
= control target key end

     0   :  { %9 = vsyncpa [#allocation3], 0  ;;  %s1360_s0 = inlined_call_operand.vmem [shape: f32[2,4,256], index: 0, kind: input, shape index: {}]   ;;  %s1361_s1 = inlined_call_operand.vmem [shape: f32[8,4], index: 1, kind: input, shape index: {}]   ;;  %s1362_s2 = inlined_call_operand.vmem [shape: f32[8,1], index: 2, kind: input, shape index: {}]   ;;  %s1363_s3 = inlined_call_operand.hbm [shape: f32[256,1024], index: 3, kind: input, shape index: {}]   ;;  %s1364_s4 = inlined_call_operand.hbm [shape: f32[2,8,1024], index: 4, kind: output, shape index: {}]  }
   0x1   :  { %10 = vsyncpa [#allocation4], 0 }
   0x2   :  { %12 = vsyncpa [#allocation4 + $0x1], 0  ;;  %s1219_s15 = smov 0   ;;  %s1221_s16 = smov 0  }
   0x3   :  { %s1223_s17 = smov 0   ;;  %s1225_s18 = smov 0  }
   0x4   :  { %s1227_s19 = smov 0   ;;  %s1229_s20 = smov 0  }
   0x5 LB: > { %s985_s21 = sadd.s32 4294967295, %s1188_s20   ;;  %s986_s22 = sadd.s32 4294967294, %s1188_s20   ;;  %s1188_s20 = sphi %s1229_s20, %s18_s20   ;;  %s1184_s19 = sphi %s1227_s19, %s1371_s19   ;;  %s1180_s18 = sphi %s1225_s18, %s1370_s18   ;;  %s1176_s17 = sphi %s1223_s17, %s1369_s17   ;;  %s1172_s16 = sphi %s1221_s16, %s1368_s16   ;;  %s1168_s15 = sphi %s1219_s15, %s1367_s15  }
   0x6   : > { %s27_s23 = sadd.s32 1, %s1184_s19  ;;  %s133_s24 = sadd.s32 1, %s1176_s17 }
   0x7   : > { %p28_p0 = scmp.ge.s32.totalorder %s27_s23, 2  ;;  %p143_p1 = scmp.ne.s32.totalorder %s1176_s17, %s1172_s16 }
   0x8   : > { %p144_p2 = scmp.eq.s32.totalorder %s985_s21, 1  ;;  %p149_p3 = scmp.ne.s32.totalorder %s1172_s16, %s1168_s15 }
   0x9   : > { %s1373_s23 = smov (%p28_p0, %s27_s23), 0  ;;  %p150_p5 = scmp.eq.s32.totalorder %s986_s22, 1 }
   0xa   : > { %p1259_p4 = por %p144_p2, %p143_p1  ;;  %s128_s26 = ssub.s32 %s1184_s19, %s1373_s23 }
   0xb   : > { %p987_p6 = scmp.ge.s32.totalorder %s1188_s20, 1  ;;  %p131_p7 = scmp.eq.s32.totalorder %s128_s26, 0 }
   0xc   : > { %p1266_p8 = por %p150_p5, %p149_p3  ;;  %p157_p9 = scmp.lt.s32.totalorder %s1188_s20, 3 }
   0xd   : > { %s1272_s28 = scalar_select %p131_p7, %s1176_s17, %s133_s24  }
   0xe   : > { %p158_p10 = pnand %p987_p6, %p157_p9  ;;  %p1020_p11 = scmp.eq.s32.totalorder %s985_s21, 0 }
   0xf   : > { %s177_s5 = sshll.u32 %s1363_s3, 4  ;;  %s1190_s6 = smov [#allocation2]   ;;  %s178_s5 = int_to_ptr.hbm [resolvable:$true] %s177_s5 }
  0x10   : > { %p1012_p12 = pneg %p158_p10  ;;  %s179_s7 = sshll.u32 %s1190_s6, 4  ;;  %s180_s7 = int_to_ptr.vmem [resolvable:$true] %s179_s7 }
  0x11   : > { %s1191_s8 = smov 1024   ;;  %s1192_s9 = smov 64  }
  0x12   : > { %p1013_p13 = pnand %p1020_p11, %p1012_p12  ;;  %203 = sbr.rel (%p158_p10) target bundleno = 375 (0x177), region = 36 }
  0x14   : > { %1015 = dma.hbm_to_vmem [thread:$0]  (!%p1013_p13), %s178_s5, 32768, %s180_s7, [#allocation3], %s1191_s8, %s1191_s8, %s1192_s9  }
  0x17   : > { %1159 = dma.done.wait (%p1020_p11), [#allocation3], 32768  }
  0x18   : > { %1161 = vsyncadd (%p1020_p11), [#allocation3], 4294934528  ;;  %p230_p0 = scmp.lt.s32.totalorder %s1180_s18, 1  ;;  %v412_v1 = vld [vmem:[#allocation2 + $0x3c0] sm:$0xff]  ;;  %vm247_vm0 = vcmask 1043456   ;;  %v237_v9 = vld [vmem:[%s1361_s1] sm:$0xff] }
  0x19   : > { %554 = vmatpush.msra.mxu2 %v412_v1  ;;  %v540_v2 = vld [vmem:[#allocation2 + $0x7c0] sm:$0xff]  ;;  %vm243_vm1 = vcmask 31744   ;;  %v413_v10 = vld [vmem:[#allocation2 + $0x3c8] sm:$0xff]  ;;  %v414_v62 = vld [vmem:[#allocation2 + $0x3d0] sm:$0xff]  ;;  %s227_s29 = sand.u32 1, %s1172_s16   ;;  %s1005_s6 = sshll.u32 %s1180_s18, 6 }
  0x1a   : > { %s231_s10 = scalar_select %p230_p0, %s1180_s18, 1  ;;  %574 = vmatpush.msra.mxu3 %v540_v2  ;;  %v404_v3 = vld [vmem:[#allocation2 + $0x380] sm:$0xff]  ;;  %v541_v11 = vld [vmem:[#allocation2 + $0x7c8] sm:$0xff]  ;;  %v542_v63 = vld [vmem:[#allocation2 + $0x7d0] sm:$0xff] }
  0x1b   : > { %v532_v4 = vld [vmem:[#allocation2 + $0x780] sm:$0xff]  ;;  %555 = vmatpush.msra.mxu2 %v404_v3  ;;  %v405_v16 = vld [vmem:[#allocation2 + $0x388] sm:$0xff]  ;;  %v406_v2 = vld [vmem:[#allocation2 + $0x390] sm:$0xff]  ;;  %s992_s30 = sshll.u32 %s227_s29, 6  ;;  %s896_s9 = scalar_lea.hbm %s1364_s4, %s1005_s6 }
  0x1c   : > { %s1004_s11 = sshll.u32 %s231_s10, 3  ;;  %v396_v5 = vld [vmem:[#allocation2 + $0x340] sm:$0xff]  ;;  %575 = vmatpush.msra.mxu3 %v532_v4  ;;  %v533_v17 = vld [vmem:[#allocation2 + $0x788] sm:$0xff]  ;;  %v534_v3 = vld [vmem:[#allocation2 + $0x790] sm:$0xff]  ;;  %s1311_s5 = scalar_lea.vmem [#allocation5], %s992_s30 }
  0x1d   : > { %s234_s14 = scalar_lea.vmem %s1360_s0, %s1004_s11  ;;  %v524_v6 = vld [vmem:[#allocation2 + $0x740] sm:$0xff]  ;;  %556 = vmatpush.msra.mxu2 %v396_v5  ;;  %v397_v20 = vld [vmem:[#allocation2 + $0x348] sm:$0xff]  ;;  %s898_s10 = sshll.u32 %s1311_s5, 4  ;;  %s899_s10 = int_to_ptr.vmem [resolvable:$true] %s898_s10 }
  0x1e   : > { %v238_v0 = vld [vmem:[%s234_s14] sm:$0xff]  ;;  %v388_v7 = vld [vmem:[#allocation2 + $0x300] sm:$0xff]  ;;  %576 = vmatpush.msra.mxu3 %v524_v6  ;;  %v525_v21 = vld [vmem:[#allocation2 + $0x748] sm:$0xff]  ;;  %s900_s11 = sshll.u32 %s896_s9, 4  ;;  %s883_s18 = scalar_lea.sflag [#allocation4], %s227_s29  ;;  %s901_s11 = int_to_ptr.hbm [resolvable:$true] %s900_s11 }
  0x1f   : > { %240 = vst [vmem:[#allocation1] ss:$2 sm:$0xff] %v238_v0  ;;  %v516_v8 = vld [vmem:[#allocation2 + $0x700] sm:$0xff]  ;;  %557 = vmatpush.msra.mxu2 %v388_v7  ;;  %v389_v24 = vld [vmem:[#allocation2 + $0x308] sm:$0xff]  ;;  %v398_v6 = vld [vmem:[#allocation2 + $0x350] sm:$0xff]  ;;  %s1120_s12 = sshra.s32 %s901_s11, 4  ;;  %s1121_s12 = int_to_ptr.hbm [resolvable:$true] %s1120_s12 }
  0x20   : > { %577 = vmatpush.msra.mxu3 %v516_v8  ;;  %v380_v14 = vld [vmem:[#allocation2 + $0x2c0] sm:$0xff]  ;;  %v517_v25 = vld [vmem:[#allocation2 + $0x708] sm:$0xff]  ;;  %v526_v7 = vld [vmem:[#allocation2 + $0x750] sm:$0xff]  ;;  %s1122_s13 = scalar_lea.hbm %s1121_s12, 64  ;;  %s1126_s22 = scalar_lea.hbm %s1364_s4, 128 }
  0x21   : > { %v508_v15 = vld [vmem:[#allocation2 + $0x6c0] sm:$0xff]  ;;  %558 = vmatpush.msra.mxu2 %v380_v14  ;;  %v381_v28 = vld [vmem:[#allocation2 + $0x2c8] sm:$0xff]  ;;  %v407_v14 = vld [vmem:[#allocation2 + $0x398] sm:$0xff]  ;;  %p1123_p1 = scmp.ne.s32.totalorder %s1121_s12, %s1122_s13  ;;  %p1127_p5 = scmp.lt.s32.totalorder %s1121_s12, %s1364_s4 }
  0x22   : > { %v372_v18 = vld [vmem:[#allocation2 + $0x280] sm:$0xff]  ;;  %578 = vmatpush.msra.mxu3 %v508_v15  ;;  %v509_v29 = vld [vmem:[#allocation2 + $0x6c8] sm:$0xff]  ;;  %v535_v15 = vld [vmem:[#allocation2 + $0x798] sm:$0xff]  ;;  %p1128_p6 = scmp.lt.s32.totalorder %s1126_s22, %s1122_s13 }
  0x23   : > { %v500_v19 = vld [vmem:[#allocation2 + $0x680] sm:$0xff]  ;;  %559 = vmatpush.msra.mxu2 %v372_v18  ;;  %v373_v32 = vld [vmem:[#allocation2 + $0x288] sm:$0xff]  ;;  %v399_v18 = vld [vmem:[#allocation2 + $0x358] sm:$0xff]  ;;  %p1124_p2 = pnand %p1123_p1, %p1259_p4 }
  0x24   : > { %v364_v22 = vld [vmem:[#allocation2 + $0x240] sm:$0xff]  ;;  %579 = vmatpush.msra.mxu3 %v500_v19  ;;  %v501_v33 = vld [vmem:[#allocation2 + $0x688] sm:$0xff]  ;;  %v527_v19 = vld [vmem:[#allocation2 + $0x758] sm:$0xff]  ;;  %p1129_p7 = por %p1128_p6, %p1127_p5 }
  0x25   : > { %v492_v23 = vld [vmem:[#allocation2 + $0x640] sm:$0xff]  ;;  %560 = vmatpush.msra.mxu2 %v364_v22  ;;  %v365_v36 = vld [vmem:[#allocation2 + $0x248] sm:$0xff]  ;;  %v391_v22 = vld [vmem:[#allocation2 + $0x318] sm:$0xff]  ;;  %p1125_p3 = pneg %p1124_p2 }
  0x26   : > { %v241_v12 = vld.sshfl [vmem:[#allocation1] sm:$0xff pattern:$0x75316420]  ;;  %v242_v13 = vld.sshfl [vmem:[#allocation1 + $0x8] sm:$0xff pattern:$0x75316420]  ;;  %580 = vmatpush.msra.mxu3 %v492_v23 }
  0x27   : > { %995 = vmatpush.msk.msra.mxu0 %vm247_vm0, %v241_v12  ;;  %997 = vmatpush.msk.msra.mxu1 %vm247_vm0, %v242_v13  ;;  %v356_v26 = vld [vmem:[#allocation2 + $0x200] sm:$0xff]  ;;  %v493_v37 = vld [vmem:[#allocation2 + $0x648] sm:$0xff]  ;;  %v390_v12 = vld [vmem:[#allocation2 + $0x310] sm:$0xff]  ;;  %p1130_p9 = pnand %p1129_p7, %p1125_p3 }
  0x28   : > { %996 = vmatmul.msk.f32.vlgmr.msra.gmra.mxu0 %vm243_vm1, %v237_v9  ;;  %998 = vmatmul.msk.f32.vlgmr.msra.gmra.mxu1 %vm243_vm1, %v237_v9  ;;  %v484_v27 = vld [vmem:[#allocation2 + $0x600] sm:$0xff]  ;;  %v357_v40 = vld [vmem:[#allocation2 + $0x208] sm:$0xff]  ;;  %v518_v13 = vld [vmem:[#allocation2 + $0x710] sm:$0xff] }
  0x29   : > { %594 = vmatpush.msrb.mxu0 %v413_v10  ;;  %614 = vmatpush.msrb.mxu1 %v541_v11  ;;  %v348_v30 = vld [vmem:[#allocation2 + $0x1c0] sm:$0xff]  ;;  %v485_v41 = vld [vmem:[#allocation2 + $0x608] sm:$0xff]  ;;  %v415_v10 = vld [vmem:[#allocation2 + $0x3d8] sm:$0xff] }
  0x2a   : > { %v476_v31 = vld [vmem:[#allocation2 + $0x5c0] sm:$0xff]  ;;  %561 = vmatpush.msra.mxu2 %v356_v26  ;;  %581 = vmatpush.msra.mxu3 %v484_v27  ;;  %v349_v44 = vld [vmem:[#allocation2 + $0x1c8] sm:$0xff]  ;;  %v543_v11 = vld [vmem:[#allocation2 + $0x7d8] sm:$0xff] }
  0x2b   : > { %595 = vmatpush.msrb.mxu0 %v405_v16  ;;  %615 = vmatpush.msrb.mxu1 %v533_v17  ;;  %v340_v34 = vld [vmem:[#allocation2 + $0x180] sm:$0xff]  ;;  %v477_v45 = vld [vmem:[#allocation2 + $0x5c8] sm:$0xff]  ;;  %v382_v16 = vld [vmem:[#allocation2 + $0x2d0] sm:$0xff] }
  0x2c   : > { %v468_v35 = vld [vmem:[#allocation2 + $0x580] sm:$0xff]  ;;  %562 = vmatpush.msra.mxu2 %v348_v30  ;;  %582 = vmatpush.msra.mxu3 %v476_v31  ;;  %v341_v48 = vld [vmem:[#allocation2 + $0x188] sm:$0xff]  ;;  %v510_v17 = vld [vmem:[#allocation2 + $0x6d0] sm:$0xff] }
  0x2d   : > { %596 = vmatpush.msrb.mxu0 %v397_v20  ;;  %616 = vmatpush.msrb.mxu1 %v525_v21  ;;  %v332_v38 = vld [vmem:[#allocation2 + $0x140] sm:$0xff]  ;;  %v469_v49 = vld [vmem:[#allocation2 + $0x588] sm:$0xff]  ;;  %v374_v20 = vld [vmem:[#allocation2 + $0x290] sm:$0xff] }
  0x2e   : > { %v460_v39 = vld [vmem:[#allocation2 + $0x540] sm:$0xff]  ;;  %563 = vmatpush.msra.mxu2 %v340_v34  ;;  %583 = vmatpush.msra.mxu3 %v468_v35  ;;  %v333_v52 = vld [vmem:[#allocation2 + $0x148] sm:$0xff]  ;;  %v502_v21 = vld [vmem:[#allocation2 + $0x690] sm:$0xff] }
  0x2f   : > { %597 = vmatpush.msrb.mxu0 %v389_v24  ;;  %617 = vmatpush.msrb.mxu1 %v517_v25  ;;  %v324_v42 = vld [vmem:[#allocation2 + $0x100] sm:$0xff]  ;;  %v461_v53 = vld [vmem:[#allocation2 + $0x548] sm:$0xff]  ;;  %v519_v23 = vld [vmem:[#allocation2 + $0x718] sm:$0xff] }
  0x30   : > { %v452_v43 = vld [vmem:[#allocation2 + $0x500] sm:$0xff]  ;;  %564 = vmatpush.msra.mxu2 %v332_v38  ;;  %584 = vmatpush.msra.mxu3 %v460_v39  ;;  %v325_v56 = vld [vmem:[#allocation2 + $0x108] sm:$0xff]  ;;  %v366_v24 = vld [vmem:[#allocation2 + $0x250] sm:$0xff] }
  0x31   : > { %598 = vmatpush.msrb.mxu0 %v381_v28  ;;  %618 = vmatpush.msrb.mxu1 %v509_v29  ;;  %v316_v46 = vld [vmem:[#allocation2 + $0xc0] sm:$0xff]  ;;  %v453_v57 = vld [vmem:[#allocation2 + $0x508] sm:$0xff]  ;;  %v494_v25 = vld [vmem:[#allocation2 + $0x650] sm:$0xff] }
  0x32   : > { %v444_v47 = vld [vmem:[#allocation2 + $0x4c0] sm:$0xff]  ;;  %565 = vmatpush.msra.mxu2 %v324_v42  ;;  %585 = vmatpush.msra.mxu3 %v452_v43  ;;  %v317_v60 = vld [vmem:[#allocation2 + $0xc8] sm:$0xff]  ;;  %v383_v26 = vld [vmem:[#allocation2 + $0x2d8] sm:$0xff] }
  0x33   : > { %599 = vmatpush.msrb.mxu0 %v373_v32  ;;  %619 = vmatpush.msrb.mxu1 %v501_v33  ;;  %v308_v50 = vld [vmem:[#allocation2 + $0x80] sm:$0xff]  ;;  %v445_v61 = vld [vmem:[#allocation2 + $0x4c8] sm:$0xff]  ;;  %v511_v27 = vld [vmem:[#allocation2 + $0x6d8] sm:$0xff] }
  0x34   : > { %v436_v51 = vld [vmem:[#allocation2 + $0x480] sm:$0xff]  ;;  %566 = vmatpush.msra.mxu2 %v316_v46  ;;  %586 = vmatpush.msra.mxu3 %v444_v47  ;;  %v309_v0 = vld [vmem:[#allocation2 + $0x88] sm:$0xff]  ;;  %v358_v28 = vld [vmem:[#allocation2 + $0x210] sm:$0xff] }
  0x35   : > { %600 = vmatpush.msrb.mxu0 %v365_v36  ;;  %620 = vmatpush.msrb.mxu1 %v493_v37  ;;  %v300_v54 = vld [vmem:[#allocation2 + $0x40] sm:$0xff]  ;;  %v437_v1 = vld [vmem:[#allocation2 + $0x488] sm:$0xff]  ;;  %v486_v29 = vld [vmem:[#allocation2 + $0x610] sm:$0xff] }
  0x36   : > { %v428_v55 = vld [vmem:[#allocation2 + $0x440] sm:$0xff]  ;;  %567 = vmatpush.msra.mxu2 %v308_v50  ;;  %587 = vmatpush.msra.mxu3 %v436_v51  ;;  %v301_v4 = vld [vmem:[#allocation2 + $0x48] sm:$0xff]  ;;  %v375_v30 = vld [vmem:[#allocation2 + $0x298] sm:$0xff] }
  0x37   : > { %601 = vmatpush.msrb.mxu0 %v357_v40  ;;  %621 = vmatpush.msrb.mxu1 %v485_v41  ;;  %v292_v58 = vld [vmem:[#allocation2] sm:$0xff]  ;;  %v429_v5 = vld [vmem:[#allocation2 + $0x448] sm:$0xff]  ;;  %v503_v31 = vld [vmem:[#allocation2 + $0x698] sm:$0xff] }
  0x38   : > { %v420_v59 = vld [vmem:[#allocation2 + $0x400] sm:$0xff]  ;;  %568 = vmatpush.msra.mxu2 %v300_v54  ;;  %588 = vmatpush.msra.mxu3 %v428_v55  ;;  %v293_v8 = vld [vmem:[#allocation2 + $0x8] sm:$0xff]  ;;  %v350_v32 = vld [vmem:[#allocation2 + $0x1d0] sm:$0xff] }
  0x39   : > { %602 = vmatpush.msrb.mxu0 %v349_v44  ;;  %622 = vmatpush.msrb.mxu1 %v477_v45  ;;  %v421_v9 = vld [vmem:[#allocation2 + $0x408] sm:$0xff]  ;;  %v478_v33 = vld [vmem:[#allocation2 + $0x5d0] sm:$0xff]  ;;  %v367_v34 = vld [vmem:[#allocation2 + $0x258] sm:$0xff] }
  0x3a   : > { %569 = vmatpush.msra.mxu2 %v292_v58  ;;  %589 = vmatpush.msra.mxu3 %v420_v59  ;;  %v495_v35 = vld [vmem:[#allocation2 + $0x658] sm:$0xff]  ;;  %v342_v36 = vld [vmem:[#allocation2 + $0x190] sm:$0xff] }
  0x3b   : > { %603 = vmatpush.msrb.mxu0 %v341_v48  ;;  %623 = vmatpush.msrb.mxu1 %v469_v49  ;;  %v470_v37 = vld [vmem:[#allocation2 + $0x590] sm:$0xff]  ;;  %v359_v38 = vld [vmem:[#allocation2 + $0x218] sm:$0xff] }
  0x3c   : > { %634 = vmatpush.msrb.mxu2 %v414_v62  ;;  %654 = vmatpush.msrb.mxu3 %v542_v63  ;;  %v487_v39 = vld [vmem:[#allocation2 + $0x618] sm:$0xff]  ;;  %v334_v40 = vld [vmem:[#allocation2 + $0x150] sm:$0xff] }
  0x3d   : > { %604 = vmatpush.msrb.mxu0 %v333_v52  ;;  %624 = vmatpush.msrb.mxu1 %v461_v53  ;;  %v462_v41 = vld [vmem:[#allocation2 + $0x550] sm:$0xff]  ;;  %v351_v42 = vld [vmem:[#allocation2 + $0x1d8] sm:$0xff] }
  0x3e   : > { %635 = vmatpush.msrb.mxu2 %v406_v2  ;;  %655 = vmatpush.msrb.mxu3 %v534_v3  ;;  %v479_v43 = vld [vmem:[#allocation2 + $0x5d8] sm:$0xff]  ;;  %v326_v44 = vld [vmem:[#allocation2 + $0x110] sm:$0xff] }
  0x3f   : > { %605 = vmatpush.msrb.mxu0 %v325_v56  ;;  %625 = vmatpush.msrb.mxu1 %v453_v57  ;;  %v454_v45 = vld [vmem:[#allocation2 + $0x510] sm:$0xff]  ;;  %v343_v46 = vld [vmem:[#allocation2 + $0x198] sm:$0xff] }
  0x40   : > { %636 = vmatpush.msrb.mxu2 %v398_v6  ;;  %656 = vmatpush.msrb.mxu3 %v526_v7  ;;  %v471_v47 = vld [vmem:[#allocation2 + $0x598] sm:$0xff]  ;;  %v318_v48 = vld [vmem:[#allocation2 + $0xd0] sm:$0xff] }
  0x41   : > { %606 = vmatpush.msrb.mxu0 %v317_v60  ;;  %626 = vmatpush.msrb.mxu1 %v445_v61  ;;  %v446_v49 = vld [vmem:[#allocation2 + $0x4d0] sm:$0xff]  ;;  %v335_v50 = vld [vmem:[#allocation2 + $0x158] sm:$0xff] }
  0x42   : > { %637 = vmatpush.msrb.mxu2 %v390_v12  ;;  %657 = vmatpush.msrb.mxu3 %v518_v13  ;;  %v463_v51 = vld [vmem:[#allocation2 + $0x558] sm:$0xff]  ;;  %v310_v52 = vld [vmem:[#allocation2 + $0x90] sm:$0xff]  ;;  %v408_v12 = vld [vmem:[#allocation2 + $0x3a0] sm:$0xff] }
  0x43   : > { %607 = vmatpush.msrb.mxu0 %v309_v0  ;;  %627 = vmatpush.msrb.mxu1 %v437_v1  ;;  %v438_v53 = vld [vmem:[#allocation2 + $0x490] sm:$0xff]  ;;  %v327_v54 = vld [vmem:[#allocation2 + $0x118] sm:$0xff]  ;;  %v536_v13 = vld [vmem:[#allocation2 + $0x7a0] sm:$0xff] }
  0x44   : > { %638 = vmatpush.msrb.mxu2 %v382_v16  ;;  %658 = vmatpush.msrb.mxu3 %v510_v17  ;;  %v455_v55 = vld [vmem:[#allocation2 + $0x518] sm:$0xff]  ;;  %v302_v56 = vld [vmem:[#allocation2 + $0x50] sm:$0xff]  ;;  %v400_v16 = vld [vmem:[#allocation2 + $0x360] sm:$0xff] }
  0x45   : > { %608 = vmatpush.msrb.mxu0 %v301_v4  ;;  %628 = vmatpush.msrb.mxu1 %v429_v5  ;;  %v430_v57 = vld [vmem:[#allocation2 + $0x450] sm:$0xff]  ;;  %v319_v58 = vld [vmem:[#allocation2 + $0xd8] sm:$0xff]  ;;  %v1193_v4 = vmov 0   ;;  %v528_v17 = vld [vmem:[#allocation2 + $0x760] sm:$0xff] }
  0x46   : > { %639 = vmatpush.msrb.mxu2 %v374_v20  ;;  %659 = vmatpush.msrb.mxu3 %v502_v21  ;;  %v447_v59 = vld [vmem:[#allocation2 + $0x4d8] sm:$0xff]  ;;  %v294_v0 = vld [vmem:[#allocation2 + $0x10] sm:$0xff]  ;;  %v392_v20 = vld [vmem:[#allocation2 + $0x320] sm:$0xff] }
  0x47   : > { %609 = vmatpush.msrb.mxu0 %v293_v8  ;;  %629 = vmatpush.msrb.mxu1 %v421_v9  ;;  %v311_v60 = vld [vmem:[#allocation2 + $0x98] sm:$0xff]  ;;  %v422_v1 = vld [vmem:[#allocation2 + $0x410] sm:$0xff]  ;;  %v416_v8 = vld [vmem:[#allocation2 + $0x3e0] sm:$0xff] }
  0x48   : > { %640 = vmatpush.msrb.mxu2 %v366_v24  ;;  %660 = vmatpush.msrb.mxu3 %v494_v25  ;;  %v439_v61 = vld [vmem:[#allocation2 + $0x498] sm:$0xff]  ;;  %v544_v9 = vld [vmem:[#allocation2 + $0x7e0] sm:$0xff] }
  0x49   : > { %674 = vmatpush.msra.mxu0 %v415_v10  ;;  %694 = vmatpush.msra.mxu1 %v543_v11  ;;  %v303_v62 = vld [vmem:[#allocation2 + $0x58] sm:$0xff]  ;;  %v417_v10 = vld [vmem:[#allocation2 + $0x3e8] sm:$0xff]  ;;  %v520_v21 = vld [vmem:[#allocation2 + $0x720] sm:$0xff] }
  0x4a   : > { %641 = vmatpush.msrb.mxu2 %v358_v28  ;;  %661 = vmatpush.msrb.mxu3 %v486_v29  ;;  %v431_v63 = vld [vmem:[#allocation2 + $0x458] sm:$0xff]  ;;  %v545_v11 = vld [vmem:[#allocation2 + $0x7e8] sm:$0xff]  ;;  %v384_v24 = vld [vmem:[#allocation2 + $0x2e0] sm:$0xff] }
  0x4b   : > { %675 = vmatpush.msra.mxu0 %v407_v14  ;;  %695 = vmatpush.msra.mxu1 %v535_v15  ;;  %v295_v2 = vld [vmem:[#allocation2 + $0x18] sm:$0xff]  ;;  %v409_v14 = vld [vmem:[#allocation2 + $0x3a8] sm:$0xff]  ;;  %v512_v25 = vld [vmem:[#allocation2 + $0x6e0] sm:$0xff] }
  0x4c   : > { %642 = vmatpush.msrb.mxu2 %v350_v32  ;;  %662 = vmatpush.msrb.mxu3 %v478_v33  ;;  %v423_v3 = vld [vmem:[#allocation2 + $0x418] sm:$0xff]  ;;  %v537_v15 = vld [vmem:[#allocation2 + $0x7a8] sm:$0xff]  ;;  %v376_v28 = vld [vmem:[#allocation2 + $0x2a0] sm:$0xff] }
  0x4d   : > { %676 = vmatpush.msra.mxu0 %v399_v18  ;;  %696 = vmatpush.msra.mxu1 %v527_v19  ;;  %v548_v5 = vld [vmem:[%s1362_s2] sm:$0xff]  ;;  %v401_v18 = vld [vmem:[#allocation2 + $0x368] sm:$0xff]  ;;  %v504_v29 = vld [vmem:[#allocation2 + $0x6a0] sm:$0xff] }
  0x4e   : > { %643 = vmatpush.msrb.mxu2 %v342_v36  ;;  %663 = vmatpush.msrb.mxu3 %v470_v37  ;;  %v529_v19 = vld [vmem:[#allocation2 + $0x768] sm:$0xff]  ;;  %v368_v32 = vld [vmem:[#allocation2 + $0x260] sm:$0xff] }
  0x4f   : > { %677 = vmatpush.msra.mxu0 %v391_v22  ;;  %697 = vmatpush.msra.mxu1 %v519_v23  ;;  %v393_v22 = vld [vmem:[#allocation2 + $0x328] sm:$0xff]  ;;  %v496_v33 = vld [vmem:[#allocation2 + $0x660] sm:$0xff] }
  0x50   : > { %644 = vmatpush.msrb.mxu2 %v334_v40  ;;  %664 = vmatpush.msrb.mxu3 %v462_v41  ;;  %v521_v23 = vld [vmem:[#allocation2 + $0x728] sm:$0xff]  ;;  %v360_v36 = vld [vmem:[#allocation2 + $0x220] sm:$0xff] }
  0x51   : > { %678 = vmatpush.msra.mxu0 %v383_v26  ;;  %698 = vmatpush.msra.mxu1 %v511_v27  ;;  %v385_v26 = vld [vmem:[#allocation2 + $0x2e8] sm:$0xff]  ;;  %v488_v37 = vld [vmem:[#allocation2 + $0x620] sm:$0xff] }
  0x52   : > { %645 = vmatpush.msrb.mxu2 %v326_v44  ;;  %665 = vmatpush.msrb.mxu3 %v454_v45  ;;  %v513_v27 = vld [vmem:[#allocation2 + $0x6e8] sm:$0xff]  ;;  %v352_v40 = vld [vmem:[#allocation2 + $0x1e0] sm:$0xff] }
  0x53   : > { %679 = vmatpush.msra.mxu0 %v375_v30  ;;  %699 = vmatpush.msra.mxu1 %v503_v31  ;;  %v377_v30 = vld [vmem:[#allocation2 + $0x2a8] sm:$0xff]  ;;  %v480_v41 = vld [vmem:[#allocation2 + $0x5e0] sm:$0xff] }
  0x54   : > { %646 = vmatpush.msrb.mxu2 %v318_v48  ;;  %666 = vmatpush.msrb.mxu3 %v446_v49  ;;  %v505_v31 = vld [vmem:[#allocation2 + $0x6a8] sm:$0xff]  ;;  %v344_v44 = vld [vmem:[#allocation2 + $0x1a0] sm:$0xff] }
  0x55   : > { %680 = vmatpush.msra.mxu0 %v367_v34  ;;  %700 = vmatpush.msra.mxu1 %v495_v35  ;;  %v369_v34 = vld [vmem:[#allocation2 + $0x268] sm:$0xff]  ;;  %v472_v45 = vld [vmem:[#allocation2 + $0x5a0] sm:$0xff] }
  0x56   : > { %647 = vmatpush.msrb.mxu2 %v310_v52  ;;  %667 = vmatpush.msrb.mxu3 %v438_v53  ;;  %v497_v35 = vld [vmem:[#allocation2 + $0x668] sm:$0xff]  ;;  %v336_v48 = vld [vmem:[#allocation2 + $0x160] sm:$0xff] }
  0x57   : > { %681 = vmatpush.msra.mxu0 %v359_v38  ;;  %701 = vmatpush.msra.mxu1 %v487_v39  ;;  %v361_v38 = vld [vmem:[#allocation2 + $0x228] sm:$0xff]  ;;  %v464_v49 = vld [vmem:[#allocation2 + $0x560] sm:$0xff] }
  0x58   : > { %648 = vmatpush.msrb.mxu2 %v302_v56  ;;  %668 = vmatpush.msrb.mxu3 %v430_v57  ;;  %v489_v39 = vld [vmem:[#allocation2 + $0x628] sm:$0xff]  ;;  %v328_v52 = vld [vmem:[#allocation2 + $0x120] sm:$0xff] }
  0x59   : > { %682 = vmatpush.msra.mxu0 %v351_v42  ;;  %702 = vmatpush.msra.mxu1 %v479_v43  ;;  %v353_v42 = vld [vmem:[#allocation2 + $0x1e8] sm:$0xff]  ;;  %v456_v53 = vld [vmem:[#allocation2 + $0x520] sm:$0xff] }
  0x5a   : > { %649 = vmatpush.msrb.mxu2 %v294_v0  ;;  %669 = vmatpush.msrb.mxu3 %v422_v1  ;;  %v481_v43 = vld [vmem:[#allocation2 + $0x5e8] sm:$0xff]  ;;  %v320_v56 = vld [vmem:[#allocation2 + $0xe0] sm:$0xff] }
  0x5b   : > { %683 = vmatpush.msra.mxu0 %v343_v46  ;;  %703 = vmatpush.msra.mxu1 %v471_v47  ;;  %v345_v46 = vld [vmem:[#allocation2 + $0x1a8] sm:$0xff]  ;;  %v448_v57 = vld [vmem:[#allocation2 + $0x4e0] sm:$0xff] }
  0x5c   : > { %1075 = vset.pattern.permute.xlu0 %v1193_v4  ;;  %v473_v47 = vld [vmem:[#allocation2 + $0x5a8] sm:$0xff]  ;;  %v304_v0 = vld [vmem:[#allocation2 + $0x60] sm:$0xff] }
  0x5d   : > { %684 = vmatpush.msra.mxu0 %v335_v50  ;;  %704 = vmatpush.msra.mxu1 %v463_v51  ;;  %v337_v50 = vld [vmem:[#allocation2 + $0x168] sm:$0xff]  ;;  %v432_v1 = vld [vmem:[#allocation2 + $0x460] sm:$0xff] }
  0x5e   : > { %551 = vperm.xlu0 %1075, %v548_v5   ;;  %v465_v51 = vld [vmem:[#allocation2 + $0x568] sm:$0xff]  ;;  %v296_v4 = vld [vmem:[#allocation2 + $0x20] sm:$0xff] }
  0x5f   : > { %685 = vmatpush.msra.mxu0 %v327_v54  ;;  %705 = vmatpush.msra.mxu1 %v455_v55  ;;  %v329_v54 = vld [vmem:[#allocation2 + $0x128] sm:$0xff]  ;;  %v424_v5 = vld [vmem:[#allocation2 + $0x420] sm:$0xff] }
  0x60   : > { %v457_v55 = vld [vmem:[#allocation2 + $0x528] sm:$0xff] }
  0x61   : > { %686 = vmatpush.msra.mxu0 %v319_v58  ;;  %706 = vmatpush.msra.mxu1 %v447_v59  ;;  %v321_v58 = vld [vmem:[#allocation2 + $0xe8] sm:$0xff] }
  0x62   : > { %v449_v59 = vld [vmem:[#allocation2 + $0x4e8] sm:$0xff] }
  0x63   : > { %687 = vmatpush.msra.mxu0 %v311_v60  ;;  %707 = vmatpush.msra.mxu1 %v439_v61  ;;  %v312_v60 = vld [vmem:[#allocation2 + $0xa0] sm:$0xff] }
  0x64   : > { %v440_v61 = vld [vmem:[#allocation2 + $0x4a0] sm:$0xff] }
  0x65   : > { %688 = vmatpush.msra.mxu0 %v303_v62  ;;  %708 = vmatpush.msra.mxu1 %v431_v63  ;;  %v313_v62 = vld [vmem:[#allocation2 + $0xa8] sm:$0xff] }
  0x66   : > { %v441_v63 = vld [vmem:[#allocation2 + $0x4a8] sm:$0xff] }
  0x67   : > { %689 = vmatpush.msra.mxu0 %v295_v2  ;;  %709 = vmatpush.msra.mxu1 %v423_v3  ;;  %v305_v2 = vld [vmem:[#allocation2 + $0x68] sm:$0xff] }
  0x68   : > { %v433_v3 = vld [vmem:[#allocation2 + $0x468] sm:$0xff] }
  0xa5   : > { %v1288_v6 = vpop.f32.mrf.mxu0  ;;  %v1290_v7 = vpop.f32.mrf.mxu1 }
  0xa6   : > { %570 = vmatmul.f32.vlgmr.msra.gmra.mxu2 %v1288_v6  ;;  %590 = vmatmul.f32.vlgmr.msra.gmra.mxu3 %v1290_v7 }
  0xa7   : > { %610 = vmatmul.f32.vlgmr.msrb.gmra.mxu0 %v1288_v6  ;;  %630 = vmatmul.f32.vlgmr.msrb.gmra.mxu1 %v1290_v7 }
  0xa8   : > { %714 = vmatpush.msra.mxu2 %v416_v8  ;;  %734 = vmatpush.msra.mxu3 %v544_v9  ;;  %v297_v8 = vld [vmem:[#allocation2 + $0x28] sm:$0xff] }
  0xa9   : > { %754 = vmatpush.msrb.mxu0 %v417_v10  ;;  %774 = vmatpush.msrb.mxu1 %v545_v11  ;;  %v425_v9 = vld [vmem:[#allocation2 + $0x428] sm:$0xff]  ;;  %v418_v10 = vld [vmem:[#allocation2 + $0x3f0] sm:$0xff] }
  0xaa   : > { %715 = vmatpush.msra.mxu2 %v408_v12  ;;  %735 = vmatpush.msra.mxu3 %v536_v13  ;;  %v546_v11 = vld [vmem:[#allocation2 + $0x7f0] sm:$0xff]  ;;  %v419_v12 = vld [vmem:[#allocation2 + $0x3f8] sm:$0xff] }
  0xab   : > { %755 = vmatpush.msrb.mxu0 %v409_v14  ;;  %775 = vmatpush.msrb.mxu1 %v537_v15  ;;  %v547_v13 = vld [vmem:[#allocation2 + $0x7f8] sm:$0xff]  ;;  %v410_v14 = vld [vmem:[#allocation2 + $0x3b0] sm:$0xff] }
  0xac   : > { %716 = vmatpush.msra.mxu2 %v400_v16  ;;  %736 = vmatpush.msra.mxu3 %v528_v17  ;;  %v538_v15 = vld [vmem:[#allocation2 + $0x7b0] sm:$0xff]  ;;  %v411_v16 = vld [vmem:[#allocation2 + $0x3b8] sm:$0xff] }
  0xad   : > { %756 = vmatpush.msrb.mxu0 %v401_v18  ;;  %776 = vmatpush.msrb.mxu1 %v529_v19  ;;  %v539_v17 = vld [vmem:[#allocation2 + $0x7b8] sm:$0xff]  ;;  %v402_v18 = vld [vmem:[#allocation2 + $0x370] sm:$0xff] }
  0xae   : > { %717 = vmatpush.msra.mxu2 %v392_v20  ;;  %737 = vmatpush.msra.mxu3 %v520_v21  ;;  %v530_v19 = vld [vmem:[#allocation2 + $0x770] sm:$0xff]  ;;  %v403_v20 = vld [vmem:[#allocation2 + $0x378] sm:$0xff] }
  0xaf   : > { %757 = vmatpush.msrb.mxu0 %v393_v22  ;;  %777 = vmatpush.msrb.mxu1 %v521_v23  ;;  %v531_v21 = vld [vmem:[#allocation2 + $0x778] sm:$0xff]  ;;  %v394_v22 = vld [vmem:[#allocation2 + $0x330] sm:$0xff] }
  0xb0   : > { %650 = vmatmul.f32.vlgmr.msrb.gmra.mxu2 %v1288_v6  ;;  %670 = vmatmul.f32.vlgmr.msrb.gmra.mxu3 %v1290_v7  ;;  %v522_v23 = vld [vmem:[#allocation2 + $0x730] sm:$0xff] }
  0xb1   : > { %690 = vmatmul.f32.vlgmr.msra.gmra.mxu0 %v1288_v6  ;;  %710 = vmatmul.f32.vlgmr.msra.gmra.mxu1 %v1290_v7 }
  0xb2   : > { %718 = vmatpush.msra.mxu2 %v384_v24  ;;  %738 = vmatpush.msra.mxu3 %v512_v25  ;;  %v395_v24 = vld [vmem:[#allocation2 + $0x338] sm:$0xff] }
  0xb3   : > { %758 = vmatpush.msrb.mxu0 %v385_v26  ;;  %778 = vmatpush.msrb.mxu1 %v513_v27  ;;  %v523_v25 = vld [vmem:[#allocation2 + $0x738] sm:$0xff]  ;;  %v386_v26 = vld [vmem:[#allocation2 + $0x2f0] sm:$0xff] }
  0xb4   : > { %719 = vmatpush.msra.mxu2 %v376_v28  ;;  %739 = vmatpush.msra.mxu3 %v504_v29  ;;  %v514_v27 = vld [vmem:[#allocation2 + $0x6f0] sm:$0xff]  ;;  %v387_v28 = vld [vmem:[#allocation2 + $0x2f8] sm:$0xff] }
  0xb5   : > { %759 = vmatpush.msrb.mxu0 %v377_v30  ;;  %779 = vmatpush.msrb.mxu1 %v505_v31  ;;  %v515_v29 = vld [vmem:[#allocation2 + $0x6f8] sm:$0xff]  ;;  %v378_v30 = vld [vmem:[#allocation2 + $0x2b0] sm:$0xff] }
  0xb6   : > { %720 = vmatpush.msra.mxu2 %v368_v32  ;;  %740 = vmatpush.msra.mxu3 %v496_v33  ;;  %v506_v31 = vld [vmem:[#allocation2 + $0x6b0] sm:$0xff]  ;;  %v379_v32 = vld [vmem:[#allocation2 + $0x2b8] sm:$0xff] }
  0xb7   : > { %760 = vmatpush.msrb.mxu0 %v369_v34  ;;  %780 = vmatpush.msrb.mxu1 %v497_v35  ;;  %v507_v33 = vld [vmem:[#allocation2 + $0x6b8] sm:$0xff]  ;;  %v370_v34 = vld [vmem:[#allocation2 + $0x270] sm:$0xff] }
  0xb8   : > { %721 = vmatpush.msra.mxu2 %v360_v36  ;;  %741 = vmatpush.msra.mxu3 %v488_v37  ;;  %v498_v35 = vld [vmem:[#allocation2 + $0x670] sm:$0xff]  ;;  %v371_v36 = vld [vmem:[#allocation2 + $0x278] sm:$0xff] }
  0xb9   : > { %761 = vmatpush.msrb.mxu0 %v361_v38  ;;  %781 = vmatpush.msrb.mxu1 %v489_v39  ;;  %v499_v37 = vld [vmem:[#allocation2 + $0x678] sm:$0xff]  ;;  %v362_v38 = vld [vmem:[#allocation2 + $0x230] sm:$0xff] }
  0xba   : > { %722 = vmatpush.msra.mxu2 %v352_v40  ;;  %742 = vmatpush.msra.mxu3 %v480_v41  ;;  %v490_v39 = vld [vmem:[#allocation2 + $0x630] sm:$0xff]  ;;  %v363_v40 = vld [vmem:[#allocation2 + $0x238] sm:$0xff] }
  0xbb   : > { %762 = vmatpush.msrb.mxu0 %v353_v42  ;;  %782 = vmatpush.msrb.mxu1 %v481_v43  ;;  %v491_v41 = vld [vmem:[#allocation2 + $0x638] sm:$0xff]  ;;  %v354_v42 = vld [vmem:[#allocation2 + $0x1f0] sm:$0xff] }
  0xbc   : > { %723 = vmatpush.msra.mxu2 %v344_v44  ;;  %743 = vmatpush.msra.mxu3 %v472_v45  ;;  %v482_v43 = vld [vmem:[#allocation2 + $0x5f0] sm:$0xff]  ;;  %v355_v44 = vld [vmem:[#allocation2 + $0x1f8] sm:$0xff] }
  0xbd   : > { %763 = vmatpush.msrb.mxu0 %v345_v46  ;;  %783 = vmatpush.msrb.mxu1 %v473_v47  ;;  %v483_v45 = vld [vmem:[#allocation2 + $0x5f8] sm:$0xff]  ;;  %v346_v46 = vld [vmem:[#allocation2 + $0x1b0] sm:$0xff] }
  0xbe   : > { %724 = vmatpush.msra.mxu2 %v336_v48  ;;  %744 = vmatpush.msra.mxu3 %v464_v49  ;;  %v474_v47 = vld [vmem:[#allocation2 + $0x5b0] sm:$0xff]  ;;  %v347_v48 = vld [vmem:[#allocation2 + $0x1b8] sm:$0xff] }
  0xbf   : > { %764 = vmatpush.msrb.mxu0 %v337_v50  ;;  %784 = vmatpush.msrb.mxu1 %v465_v51  ;;  %v475_v49 = vld [vmem:[#allocation2 + $0x5b8] sm:$0xff]  ;;  %v338_v50 = vld [vmem:[#allocation2 + $0x170] sm:$0xff] }
  0xc0   : > { %725 = vmatpush.msra.mxu2 %v328_v52  ;;  %745 = vmatpush.msra.mxu3 %v456_v53  ;;  %v466_v51 = vld [vmem:[#allocation2 + $0x570] sm:$0xff]  ;;  %v339_v52 = vld [vmem:[#allocation2 + $0x178] sm:$0xff] }
  0xc1   : > { %765 = vmatpush.msrb.mxu0 %v329_v54  ;;  %785 = vmatpush.msrb.mxu1 %v457_v55  ;;  %v467_v53 = vld [vmem:[#allocation2 + $0x578] sm:$0xff]  ;;  %v330_v54 = vld [vmem:[#allocation2 + $0x130] sm:$0xff] }
  0xc2   : > { %726 = vmatpush.msra.mxu2 %v320_v56  ;;  %746 = vmatpush.msra.mxu3 %v448_v57  ;;  %v458_v55 = vld [vmem:[#allocation2 + $0x530] sm:$0xff]  ;;  %v331_v56 = vld [vmem:[#allocation2 + $0x138] sm:$0xff] }
  0xc3   : > { %766 = vmatpush.msrb.mxu0 %v321_v58  ;;  %786 = vmatpush.msrb.mxu1 %v449_v59  ;;  %v459_v57 = vld [vmem:[#allocation2 + $0x538] sm:$0xff]  ;;  %v322_v58 = vld [vmem:[#allocation2 + $0xf0] sm:$0xff] }
  0xc4   : > { %727 = vmatpush.msra.mxu2 %v312_v60  ;;  %747 = vmatpush.msra.mxu3 %v440_v61  ;;  %v450_v59 = vld [vmem:[#allocation2 + $0x4f0] sm:$0xff]  ;;  %v323_v60 = vld [vmem:[#allocation2 + $0xf8] sm:$0xff] }
  0xc5   : > { %767 = vmatpush.msrb.mxu0 %v313_v62  ;;  %787 = vmatpush.msrb.mxu1 %v441_v63  ;;  %v451_v61 = vld [vmem:[#allocation2 + $0x4f8] sm:$0xff]  ;;  %v314_v62 = vld [vmem:[#allocation2 + $0xb0] sm:$0xff] }
  0xc6   : > { %728 = vmatpush.msra.mxu2 %v304_v0  ;;  %748 = vmatpush.msra.mxu3 %v432_v1  ;;  %v442_v63 = vld [vmem:[#allocation2 + $0x4b0] sm:$0xff]  ;;  %v315_v0 = vld [vmem:[#allocation2 + $0xb8] sm:$0xff] }
  0xc7   : > { %768 = vmatpush.msrb.mxu0 %v305_v2  ;;  %788 = vmatpush.msrb.mxu1 %v433_v3  ;;  %v443_v1 = vld [vmem:[#allocation2 + $0x4b8] sm:$0xff]  ;;  %v306_v2 = vld [vmem:[#allocation2 + $0x70] sm:$0xff] }
  0xc8   : > { %729 = vmatpush.msra.mxu2 %v296_v4  ;;  %749 = vmatpush.msra.mxu3 %v424_v5  ;;  %v434_v3 = vld [vmem:[#allocation2 + $0x470] sm:$0xff]  ;;  %v307_v4 = vld [vmem:[#allocation2 + $0x78] sm:$0xff] }
  0xc9   : > { %769 = vmatpush.msrb.mxu0 %v297_v8  ;;  %789 = vmatpush.msrb.mxu1 %v425_v9  ;;  %v435_v5 = vld [vmem:[#allocation2 + $0x478] sm:$0xff]  ;;  %v298_v8 = vld [vmem:[#allocation2 + $0x30] sm:$0xff] }
  0xca   : > { %730 = vmatmul.f32.vlgmr.msra.gmra.mxu2 %v1288_v6  ;;  %750 = vmatmul.f32.vlgmr.msra.gmra.mxu3 %v1290_v7  ;;  %v426_v9 = vld [vmem:[#allocation2 + $0x430] sm:$0xff] }
  0xcb   : > { %770 = vmatmul.f32.vlgmr.msrb.gmra.mxu0 %v1288_v6  ;;  %790 = vmatmul.f32.vlgmr.msrb.gmra.mxu1 %v1290_v7 }
  0xcc   : > { %794 = vmatpush.msrb.mxu2 %v418_v10  ;;  %814 = vmatpush.msrb.mxu3 %v546_v11  ;;  %v299_v10 = vld [vmem:[#allocation2 + $0x38] sm:$0xff] }
  0xcd   : > { %834 = vmatpush.msra.mxu0 %v419_v12  ;;  %854 = vmatpush.msra.mxu1 %v547_v13  ;;  %v427_v11 = vld [vmem:[#allocation2 + $0x438] sm:$0xff] }
  0xce   : > { %795 = vmatpush.msrb.mxu2 %v410_v14  ;;  %815 = vmatpush.msrb.mxu3 %v538_v15 }
  0xcf   : > { %835 = vmatpush.msra.mxu0 %v411_v16  ;;  %855 = vmatpush.msra.mxu1 %v539_v17 }
  0xd0   : > { %796 = vmatpush.msrb.mxu2 %v402_v18  ;;  %816 = vmatpush.msrb.mxu3 %v530_v19  ;;  %v552_v12 = vpop.permute.xlu0 %551 }
  0xd1   : > { %836 = vmatpush.msra.mxu0 %v403_v20  ;;  %856 = vmatpush.msra.mxu1 %v531_v21 }
  0xd2   : > { %797 = vmatpush.msrb.mxu2 %v394_v22  ;;  %817 = vmatpush.msrb.mxu3 %v522_v23 }
  0xd3   : > { %837 = vmatpush.msra.mxu0 %v395_v24  ;;  %857 = vmatpush.msra.mxu1 %v523_v25 }
  0xd4   : > { %798 = vmatpush.msrb.mxu2 %v386_v26  ;;  %818 = vmatpush.msrb.mxu3 %v514_v27 }
  0xd5   : > { %838 = vmatpush.msra.mxu0 %v387_v28  ;;  %858 = vmatpush.msra.mxu1 %v515_v29 }
  0xd6   : > { %799 = vmatpush.msrb.mxu2 %v378_v30  ;;  %819 = vmatpush.msrb.mxu3 %v506_v31 }
  0xd7   : > { %839 = vmatpush.msra.mxu0 %v379_v32  ;;  %859 = vmatpush.msra.mxu1 %v507_v33 }
  0xd8   : > { %800 = vmatpush.msrb.mxu2 %v370_v34  ;;  %820 = vmatpush.msrb.mxu3 %v498_v35 }
  0xd9   : > { %840 = vmatpush.msra.mxu0 %v371_v36  ;;  %860 = vmatpush.msra.mxu1 %v499_v37 }
  0xda   : > { %801 = vmatpush.msrb.mxu2 %v362_v38  ;;  %821 = vmatpush.msrb.mxu3 %v490_v39 }
  0xdb   : > { %841 = vmatpush.msra.mxu0 %v363_v40  ;;  %861 = vmatpush.msra.mxu1 %v491_v41 }
  0xdc   : > { %802 = vmatpush.msrb.mxu2 %v354_v42  ;;  %822 = vmatpush.msrb.mxu3 %v482_v43 }
  0xdd   : > { %842 = vmatpush.msra.mxu0 %v355_v44  ;;  %862 = vmatpush.msra.mxu1 %v483_v45 }
  0xde   : > { %803 = vmatpush.msrb.mxu2 %v346_v46  ;;  %823 = vmatpush.msrb.mxu3 %v474_v47 }
  0xdf   : > { %843 = vmatpush.msra.mxu0 %v347_v48  ;;  %863 = vmatpush.msra.mxu1 %v475_v49 }
  0xe0   : > { %804 = vmatpush.msrb.mxu2 %v338_v50  ;;  %824 = vmatpush.msrb.mxu3 %v466_v51 }
  0xe1   : > { %844 = vmatpush.msra.mxu0 %v339_v52  ;;  %864 = vmatpush.msra.mxu1 %v467_v53 }
  0xe2   : > { %805 = vmatpush.msrb.mxu2 %v330_v54  ;;  %825 = vmatpush.msrb.mxu3 %v458_v55 }
  0xe3   : > { %845 = vmatpush.msra.mxu0 %v331_v56  ;;  %865 = vmatpush.msra.mxu1 %v459_v57 }
  0xe4   : > { %806 = vmatpush.msrb.mxu2 %v322_v58  ;;  %826 = vmatpush.msrb.mxu3 %v450_v59 }
  0xe5   : > { %846 = vmatpush.msra.mxu0 %v323_v60  ;;  %866 = vmatpush.msra.mxu1 %v451_v61 }
  0xe6   : > { %807 = vmatpush.msrb.mxu2 %v314_v62  ;;  %827 = vmatpush.msrb.mxu3 %v442_v63 }
  0xe7   : > { %847 = vmatpush.msra.mxu0 %v315_v0  ;;  %867 = vmatpush.msra.mxu1 %v443_v1 }
  0xe8   : > { %808 = vmatpush.msrb.mxu2 %v306_v2  ;;  %828 = vmatpush.msrb.mxu3 %v434_v3 }
  0xe9   : > { %848 = vmatpush.msra.mxu0 %v307_v4  ;;  %868 = vmatpush.msra.mxu1 %v435_v5 }
  0xea   : > { %809 = vmatpush.msrb.mxu2 %v298_v8  ;;  %829 = vmatpush.msrb.mxu3 %v426_v9 }
  0xeb   : > { %849 = vmatpush.msra.mxu0 %v299_v10  ;;  %869 = vmatpush.msra.mxu1 %v427_v11 }
  0xec   : > { %810 = vmatmul.f32.vlgmr.msrb.gmra.mxu2 %v1288_v6  ;;  %830 = vmatmul.f32.vlgmr.msrb.gmra.mxu3 %v1290_v7 }
  0xed   : > { %850 = vmatmul.f32.vlgmr.msra.gmra.mxu0 %v1288_v6  ;;  %870 = vmatmul.f32.vlgmr.msra.gmra.mxu1 %v1290_v7 }
 0x124   : > { %v611_v13 = vpop.f32.mrf.mxu0  ;;  %v631_v15 = vpop.f32.mrf.mxu1 }
 0x125   : > { %v612_v14 = vadd.f32 %v611_v13, %v552_v12 }
 0x127   : > { %v632_v16 = vadd.f32 %v631_v15, %v612_v14 }
 0x129   : > { %875 = vst [vmem:[%s1311_s5 + $0x8] sm:$0xff] %v632_v16  ;;  %v571_v17 = vpop.f32.mrf.mxu2  ;;  %v591_v6 = vpop.f32.mrf.mxu3 }
 0x12a   : > { %v572_v18 = vadd.f32 %v571_v17, %v552_v12 }
 0x12c   : > { %v592_v19 = vadd.f32 %v591_v6, %v572_v18 }
 0x12e   : > { %874 = vst [vmem:[%s1311_s5] sm:$0xff] %v592_v19  ;;  %v691_v7 = vpop.f32.mrf.mxu0  ;;  %v711_v21 = vpop.f32.mrf.mxu1 }
 0x12f   : > { %v692_v20 = vadd.f32 %v691_v7, %v552_v12 }
 0x131   : > { %v712_v22 = vadd.f32 %v711_v21, %v692_v20 }
 0x133   : > { %877 = vst [vmem:[%s1311_s5 + $0x18] sm:$0xff] %v712_v22  ;;  %v651_v23 = vpop.f32.mrf.mxu2  ;;  %v671_v25 = vpop.f32.mrf.mxu3 }
 0x134   : > { %v652_v24 = vadd.f32 %v651_v23, %v552_v12 }
 0x136   : > { %v672_v26 = vadd.f32 %v671_v25, %v652_v24 }
 0x138   : > { %876 = vst [vmem:[%s1311_s5 + $0x10] sm:$0xff] %v672_v26 }
 0x148   : > { %v771_v27 = vpop.f32.mrf.mxu0  ;;  %v791_v29 = vpop.f32.mrf.mxu1 }
 0x149   : > { %v772_v28 = vadd.f32 %v771_v27, %v552_v12 }
 0x14b   : > { %v792_v30 = vadd.f32 %v791_v29, %v772_v28 }
 0x14d   : > { %879 = vst [vmem:[%s1311_s5 + $0x28] sm:$0xff] %v792_v30  ;;  %v731_v31 = vpop.f32.mrf.mxu2  ;;  %v751_v33 = vpop.f32.mrf.mxu3 }
 0x14e   : > { %v732_v32 = vadd.f32 %v731_v31, %v552_v12 }
 0x150   : > { %v752_v34 = vadd.f32 %v751_v33, %v732_v32 }
 0x152   : > { %878 = vst [vmem:[%s1311_s5 + $0x20] sm:$0xff] %v752_v34 }
 0x16a   : > { %v851_v35 = vpop.f32.mrf.mxu0  ;;  %v871_v37 = vpop.f32.mrf.mxu1 }
 0x16b   : > { %v852_v36 = vadd.f32 %v851_v35, %v552_v12 }
 0x16d   : > { %v872_v38 = vadd.f32 %v871_v37, %v852_v36 }
 0x16f   : > { %881 = vst [vmem:[%s1311_s5 + $0x38] sm:$0xff] %v872_v38  ;;  %v811_v39 = vpop.f32.mrf.mxu2  ;;  %v831_v41 = vpop.f32.mrf.mxu3 }
 0x170   : > { %v812_v40 = vadd.f32 %v811_v39, %v552_v12 }
 0x172   : > { %v832_v42 = vadd.f32 %v831_v41, %v812_v40 }
 0x174   : > { %880 = vst [vmem:[%s1311_s5 + $0x30] sm:$0xff] %v832_v42 }
 0x175   : > { %1133 = shalt.err (!%p1130_p9)
}
 0x176   : > { %1010 = dma.vmem_to_hbm [thread:$0]  (%p1259_p4), %s899_s10, 1024, %s901_s11, %s883_s18  }
 0x177 PF: > { %p1022_p10 = scmp.ge.s32.totalorder %s1188_s20, 2  ;;  %s912_s29 = sand.u32 1, %s1168_s15  }
 0x178   : > { %s913_s30 = scalar_lea.sflag [#allocation4], %s912_s29 }
 0x179   : > { %p1017_p11 = pnand %p1022_p10, %p1266_p8 }
 0x17b   : > { %p1018_p12 = pneg %p1017_p11 }
 0x17d   : > { %1163 = dma.done.wait (%p1018_p12), %s913_s30, 1024  }
 0x17e   : > { %1165 = vsyncadd (%p1018_p12), %s913_s30, 4294966272  ;;  %s18_s20 = sadd.s32 1, %s1188_s20   ;;  %s1367_s15 = smov %s1172_s16 }
 0x17f   : > { %p15_p13 = scmp.ge.s32.totalorder %s18_s20, 4   ;;  %s1368_s16 = smov %s1176_s17 }
 0x180   : > { %s1369_s17 = smov %s1272_s28  ;;  %s1370_s18 = smov %s1184_s19 }
 0x181   : > { %s1371_s19 = smov %s1373_s23  ;;  %17 = sbr.rel (!%p15_p13) target bundleno = 5 (0x5), region = 77 }
 0x186   :  { %919 = vsyncpa [#allocation3], 1 }
 0x187   :  { %921 = vsyncpa [#allocation3 + $0x1], 1 }
 0x188   :  { %922 = vsyncpa [#allocation4], 1 }
 0x189   :  { %924 = vsyncpa [#allocation4 + $0x1], 1 }

</bundles_post_ra>
